<compile_context>
chip_gen: v6e
topology: v6e:2x2x1
jax: 0.10.0
libtpu: 0.0.40
codegen_flags: <defaults>
</compile_context>

<pallas_src>
import math

import jax
import jax.numpy as jnp
from jax.experimental import pallas as pl
from jax.experimental.pallas import tpu as pltpu

LN_EPS = 1e-5


def _patch_merging_kernel(x_ref, w_ref, b_ref, o_ref):
    """Fused 2x2 merge + LayerNorm(4C, affine folded) + Linear(4C -> Co, no bias).

    x_ref: (TR, 2, WH, 2C)  TR merged rows; axis 1 = h-parity; last axis packs the
                            two w-neighbours as [w-even C | w-odd C].
    w_ref: (2, 2C, CO)      gamma-scaled reduction weight, rows permuted to match.
    b_ref: (1, CO) f32      beta @ W^T, added once to the f32 accumulator.
    o_ref: (TR*WH, CO)
    """
    tr, _, wh, c2 = x_ref.shape
    tm = tr * wh
    inv_c4 = 1.0 / (2 * c2)
    wdt = w_ref.dtype

    # Squeeze the size-1 parity axis (free: last two dims unchanged).
    xa = x_ref[:, 0:1, :, :].reshape(tr, wh, c2)   # h-even half: [x0 | x2]
    xb = x_ref[:, 1:2, :, :].reshape(tr, wh, c2)   # h-odd  half: [x1 | x3]

    # One-pass LN statistics over the full 4C merged channel vector, in f32.
    xa32 = xa.astype(jnp.float32)
    xb32 = xb.astype(jnp.float32)
    s1 = (jnp.sum(xa32, axis=-1, keepdims=True)
          + jnp.sum(xb32, axis=-1, keepdims=True))
    s2 = (jnp.sum(xa32 * xa32, axis=-1, keepdims=True)
          + jnp.sum(xb32 * xb32, axis=-1, keepdims=True))
    mean = s1 * inv_c4
    var = jnp.maximum(s2 * inv_c4 - mean * mean, 0.0)   # biased, like torch LN
    inv = jax.lax.rsqrt(var + LN_EPS)

    # Normalize (gamma/beta already folded into w/b).  The reshape to (tm, c2) is
    # done on the narrow (weight-dtype) tensor so the relayout bytes are halved.
    if wdt == jnp.bfloat16:
        mn = mean.astype(wdt)
        iv = inv.astype(wdt)
        ya = ((xa.astype(wdt) - mn) * iv).reshape(tm, c2)
        yb = ((xb.astype(wdt) - mn) * iv).reshape(tm, c2)
    else:
        ya = ((xa32 - mean) * inv).astype(wdt).reshape(tm, c2)
        yb = ((xb32 - mean) * inv).astype(wdt).reshape(tm, c2)

    # Matmul in the weight dtype (bf16 weights -> native bf16 MXU), f32 accumulate.
    acc = jnp.dot(ya, w_ref[0], preferred_element_type=jnp.float32)
    acc = acc + jnp.dot(yb, w_ref[1], preferred_element_type=jnp.float32)
    acc = acc + b_ref[...].astype(jnp.float32)          # broadcast (1, Co)
    o_ref[...] = acc.astype(o_ref.dtype)


def _round_up(a, m):
    return ((a + m - 1) // m) * m


def _vmem_capacity_bytes():
    """Per-TensorCore VMEM capacity; conservative fallback if the query fails."""
    try:
        info = pltpu.get_tpu_info()
        cap = getattr(info, "vmem_capacity_bytes", None)
        if cap:
            return int(cap)
    except Exception:  # pragma: no cover - e.g. interpret mode
        pass
    return 64 * 1024 * 1024   # v7x per-TensorCore size (smallest current part)


def _const_block_spec(block_shape, index_map):
    """BlockSpec for a constant-index-map block: single-buffered (DMA'd once)."""
    try:
        return pl.BlockSpec(block_shape, index_map, pipeline_mode=pl.Buffered(1))
    except TypeError:   # older jax without pipeline_mode on BlockSpec
        return pl.BlockSpec(block_shape, index_map)


def prepare_patch_merging_params(gamma, beta, w_reduction):
    """One-time parameter prep (call at parameter-load time, not per forward).

    gamma, beta: (4C,) LayerNorm params.
    w_reduction: (2C, 4C) torch nn.Linear weight convention (out, in).

    Returns:
      w_stacked: (2, 2C, 2C) gamma-scaled weight, channel-permuted to the kernel's
                 (h-parity, w-parity-packed) layout, in w_reduction.dtype.
      bias_row:  (1, 2C) f32, equal to beta @ W^T.
    """
    co, c4 = w_reduction.shape
    c = c4 // 4
    c2 = 2 * c
    wdt = w_reduction.dtype

    w_f = w_reduction.astype(jnp.float32)
    g_f = gamma.astype(jnp.float32)
    b_f = beta.astype(jnp.float32)

    # Fold LN affine: out = ((x-mean)*inv) @ (diag(gamma) @ W^T) + beta @ W^T.
    w_eff = w_f * g_f[None, :]                               # (Co, 4C)
    bias_row = b_f[None, :] @ w_f.T                          # (1, Co) f32

    # Fold the torch.cat([x0,x1,x2,x3], -1) channel order: original 4C index is
    # (dh + 2*dw)*C + c; regroup as (dh, dw*C + c) to match the packed x layout.
    w_stacked = (w_eff.reshape(co, 2, 2, c)
                 .transpose(2, 1, 3, 0)
                 .reshape(2, c2, co)
                 .astype(wdt))
    return w_stacked, bias_row


def patch_merging_forward(x, input_resolution, w_stacked, bias_row,
                          *, target_block_tokens=1024, vmem_budget_bytes=None):
    """x: (B, H*W, C) -> (B, H/2*W/2, 2*C) using pre-prepared params."""
    H, W = input_resolution
    B, L, C = x.shape
    assert L == H * W, "input feature has wrong size"
    assert H % 2 == 0 and W % 2 == 0, f"x size ({H}*{W}) are not even."
    Hh, Wh = H // 2, W // 2
    C2, Co = 2 * C, 2 * C
    rows_h = B * Hh                 # merged rows (b, h//2)
    rows_tok = rows_h * Wh          # merged tokens (b, h//2, w//2)

    # Free, copy-less view: xr[r, dh, w2, dw*C + c] == x[b, 2*h2+dh, 2*w2+dw, c],
    # with r = b*Hh + h2.  No concatenate / HBM intermediate.
    xr = x.reshape(rows_h, 2, Wh, C2)

    # ---- generation-aware VMEM budget / limit ----
    cap = _vmem_capacity_bytes()
    if vmem_budget_bytes is None:
        vmem_budget_bytes = int(0.65 * cap)

    x_bytes = jnp.dtype(x.dtype).itemsize
    w_bytes = jnp.dtype(w_stacked.dtype).itemsize
    sub_x = max(8, (8 * 4) // x_bytes)          # sublane tile: 8 f32 / 16 bf16 / 32 i8
    sub_w = max(8, (8 * 4) // w_bytes)

    def _est(tr_):  # padded VMEM estimate (bytes): dbl-buffered I/O + single W + temps
        in_blk = tr_ * 2 * _round_up(Wh, sub_x) * _round_up(C2, 128) * x_bytes
        out_blk = _round_up(tr_ * Wh, sub_x) * _round_up(Co, 128) * x_bytes
        w_blk = 2 * _round_up(C2, sub_w) * _round_up(Co, 128) * w_bytes
        b_blk = 8 * _round_up(Co, 128) * 4
        interm = tr_ * _round_up(Wh, 8) * _round_up(C2, 128) * 2 * (4 + w_bytes)
        return 2 * (in_blk + out_blk) + (w_blk + b_blk) + interm

    # ---- tile selection: big row tiles, >=2 steps per v7x core, sublane-aligned ----
    mult = sub_x // math.gcd(Wh, sub_x)   # keeps the (tr*Wh, Co) output block aligned
    tr = max(1, target_block_tokens // Wh)
    if rows_h >= 4:
        tr = min(tr, pl.cdiv(rows_h, 4))  # >=4 steps: both v7x TCs get >=2 steps each
    elif rows_h >= 2:
        tr = min(tr, pl.cdiv(rows_h, 2))
    tr = _round_up(tr, mult)
    while tr > mult and _est(tr) > vmem_budget_bytes:
        tr = _round_up(max(mult, tr // 2), mult)
    if tr >= rows_h:
        tr = rows_h                        # single full block (full-dim exception)
    tm_tok = tr * Wh
    grid = (pl.cdiv(rows_h, tr),)
    vmem_limit = int(min(max(32 * 1024 * 1024, _est(tr) + (16 << 20)),
                         cap - (8 << 20)))
    vmem_limit = max(vmem_limit, 16 * 1024 * 1024)

    out2d = pl.pallas_call(
        _patch_merging_kernel,
        out_shape=jax.ShapeDtypeStruct((rows_tok, Co), x.dtype),
        grid_spec=pltpu.PrefetchScalarGridSpec(
            num_scalar_prefetch=0,
            grid=grid,
            in_specs=[
                pl.BlockSpec((tr, 2, Wh, C2), lambda i: (i, 0, 0, 0)),
                _const_block_spec((2, C2, Co), lambda i: (0, 0, 0)),
                _const_block_spec((1, Co), lambda i: (0, 0)),
            ],
            out_specs=pl.BlockSpec((tm_tok, Co), lambda i: (i, 0)),
        ),
        compiler_params=pltpu.CompilerParams(
            dimension_semantics=("parallel",),
            vmem_limit_bytes=vmem_limit,
        ),
    )(xr, w_stacked, bias_row)

    return out2d.reshape(B, Hh * Wh, Co)


def patch_merging(x, input_resolution, gamma, beta, w_reduction, **kw):
    """Convenience path taking raw module params.  In a forward loop, call
    prepare_patch_merging_params once at load time instead of per call."""
    w_s, b_s = prepare_patch_merging_params(gamma, beta, w_reduction)
    return patch_merging_forward(x, input_resolution, w_s, b_s, **kw)


def _reference(x, input_resolution, gamma, beta, w_reduction):
    """Pure-JAX reference matching the PyTorch module."""
    H, W = input_resolution
    B, L, C = x.shape
    xi = x.reshape(B, H, W, C)
    x0 = xi[:, 0::2, 0::2, :]
    x1 = xi[:, 1::2, 0::2, :]
    x2 = xi[:, 0::2, 1::2, :]
    x3 = xi[:, 1::2, 1::2, :]
    xm = jnp.concatenate([x0, x1, x2, x3], axis=-1).reshape(B, -1, 4 * C)
    mean = jnp.mean(xm, axis=-1, keepdims=True)
    var = jnp.mean((xm - mean) ** 2, axis=-1, keepdims=True)
    xn = (xm - mean) / jnp.sqrt(var + LN_EPS)
    y = xn * gamma + beta
    return jnp.einsum("blc,oc->blo", y, w_reduction)


if __name__ == "__main__":
    # Small deterministic config: B=2, C=4, H=W=16  => x: (2, 256, 4)
    B, C, H, W = 2, 4, 16, 16
    key = jax.random.PRNGKey(0)
    k_x, k_w, k_g, k_b = jax.random.split(key, 4)

    x = jax.random.normal(k_x, (B, H * W, C), dtype=jnp.float32)
    w_reduction = 0.05 * jax.random.normal(k_w, (2 * C, 4 * C), dtype=jnp.float32)
    gamma = 1.0 + 0.01 * jax.random.normal(k_g, (4 * C,), dtype=jnp.float32)
    beta = 0.01 * jax.random.normal(k_b, (4 * C,), dtype=jnp.float32)

    fwd = jax.jit(patch_merging_forward, static_argnums=(1,))

    # f32 path (close to the reference; affine is folded, one-pass variance).
    w_s, b_s = prepare_patch_merging_params(gamma, beta, w_reduction)
    out = jax.block_until_ready(fwd(x, (H, W), w_s, b_s))
    ref = _reference(x, (H, W), gamma, beta, w_reduction)
    assert out.shape == (B, (H // 2) * (W // 2), 2 * C), out.shape
    err = float(jnp.max(jnp.abs(out - ref)))
    assert jnp.allclose(out, ref, atol=2e-4, rtol=2e-4), err

    # bf16 activations + bf16 weights: native bf16 MXU path, bf16 VALU normalize.
    x_bf = x.astype(jnp.bfloat16)
    w_s_bf, b_s_bf = prepare_patch_merging_params(
        gamma.astype(jnp.bfloat16), beta.astype(jnp.bfloat16),
        w_reduction.astype(jnp.bfloat16))
    out_bf = jax.block_until_ready(fwd(x_bf, (H, W), w_s_bf, b_s_bf))
    ref_bf = _reference(x_bf.astype(jnp.float32), (H, W),
                        gamma.astype(jnp.bfloat16).astype(jnp.float32),
                        beta.astype(jnp.bfloat16).astype(jnp.float32),
                        w_reduction.astype(jnp.bfloat16).astype(jnp.float32))
    err_bf = float(jnp.max(jnp.abs(out_bf.astype(jnp.float32) - ref_bf)))
    assert out_bf.dtype == jnp.bfloat16 and err_bf < 5e-2, err_bf

    print("KERNEL_OK")
</pallas_src>

<mosaic_0001>
module attributes {stable_mosaic.version = 11 : i64} {
  func.func @_patch_merging_kernel(%arg0: i32, %arg1: memref<4x2x8x8xf32, #tpu.memory_space<vmem>>, %arg2: memref<2x8x8xf32, #tpu.memory_space<vmem>>, %arg3: memref<1x8xf32, #tpu.memory_space<vmem>>, %arg4: memref<32x8xf32, #tpu.memory_space<vmem>>) attributes {dimension_semantics = [#tpu.dimension_semantics<parallel>], iteration_bounds = array<i64: 4>, scalar_prefetch = 0 : i64, scratch_operands = 0 : i64, tpu.core_type = #tpu.core_type<tc>, window_params = [{transform_indices = @transform_0, window_bounds = array<i64: 4, 2, 8, 8>}, {pipeline_mode = #tpu.pipeline_mode<synchronous>, transform_indices = @transform_1, window_bounds = array<i64: 2, 8, 8>}, {pipeline_mode = #tpu.pipeline_mode<synchronous>, transform_indices = @transform_2, window_bounds = array<i64: 1, 8>}, {transform_indices = @transform_3, window_bounds = array<i64: 32, 8>}]} {
    %c0 = arith.constant 0 : index
    %c0_0 = arith.constant 0 : index
    %c0_1 = arith.constant 0 : index
    %c0_2 = arith.constant 0 : index
    %0 = vector.load %arg1[%c0, %c0_0, %c0_1, %c0_2] : memref<4x2x8x8xf32, #tpu.memory_space<vmem>>, vector<4x1x8x8xf32>
    %1 = vector.shape_cast %0 : vector<4x1x8x8xf32> to vector<4x8x8xf32>
    %c0_3 = arith.constant 0 : index
    %c1 = arith.constant 1 : index
    %c0_4 = arith.constant 0 : index
    %c0_5 = arith.constant 0 : index
    %2 = vector.load %arg1[%c0_3, %c1, %c0_4, %c0_5] : memref<4x2x8x8xf32, #tpu.memory_space<vmem>>, vector<4x1x8x8xf32>
    %3 = vector.shape_cast %2 : vector<4x1x8x8xf32> to vector<4x8x8xf32>
    %cst = arith.constant dense<0.000000e+00> : vector<4x8xf32>
    %4 = vector.multi_reduction <add>, %1, %cst [2] : vector<4x8x8xf32> to vector<4x8xf32>
    %5 = vector.shape_cast %4 : vector<4x8xf32> to vector<4x8x1xf32>
    %cst_6 = arith.constant dense<0.000000e+00> : vector<4x8xf32>
    %6 = vector.multi_reduction <add>, %3, %cst_6 [2] : vector<4x8x8xf32> to vector<4x8xf32>
    %7 = vector.shape_cast %6 : vector<4x8xf32> to vector<4x8x1xf32>
    %8 = arith.addf %5, %7 : vector<4x8x1xf32>
    %9 = arith.mulf %1, %1 : vector<4x8x8xf32>
    %cst_7 = arith.constant dense<0.000000e+00> : vector<4x8xf32>
    %10 = vector.multi_reduction <add>, %9, %cst_7 [2] : vector<4x8x8xf32> to vector<4x8xf32>
    %11 = vector.shape_cast %10 : vector<4x8xf32> to vector<4x8x1xf32>
    %12 = arith.mulf %3, %3 : vector<4x8x8xf32>
    %cst_8 = arith.constant dense<0.000000e+00> : vector<4x8xf32>
    %13 = vector.multi_reduction <add>, %12, %cst_8 [2] : vector<4x8x8xf32> to vector<4x8xf32>
    %14 = vector.shape_cast %13 : vector<4x8xf32> to vector<4x8x1xf32>
    %15 = arith.addf %11, %14 : vector<4x8x1xf32>
    %cst_9 = arith.constant 6.250000e-02 : f32
    %16 = vector.broadcast %cst_9 : f32 to vector<4x8x1xf32>
    %17 = arith.mulf %8, %16 : vector<4x8x1xf32>
    %cst_10 = arith.constant 6.250000e-02 : f32
    %18 = vector.broadcast %cst_10 : f32 to vector<4x8x1xf32>
    %19 = arith.mulf %15, %18 : vector<4x8x1xf32>
    %20 = arith.mulf %17, %17 : vector<4x8x1xf32>
    %21 = arith.subf %19, %20 : vector<4x8x1xf32>
    %cst_11 = arith.constant 0.000000e+00 : f32
    %22 = vector.broadcast %cst_11 : f32 to vector<4x8x1xf32>
    %23 = arith.maximumf %21, %22 : vector<4x8x1xf32>
    %cst_12 = arith.constant 9.99999974E-6 : f32
    %24 = vector.broadcast %cst_12 : f32 to vector<4x8x1xf32>
    %25 = arith.addf %23, %24 : vector<4x8x1xf32>
    %26 = math.rsqrt %25 : vector<4x8x1xf32>
    %27 = vector.broadcast %17 : vector<4x8x1xf32> to vector<4x8x8xf32>
    %28 = arith.subf %1, %27 : vector<4x8x8xf32>
    %29 = vector.broadcast %26 : vector<4x8x1xf32> to vector<4x8x8xf32>
    %30 = arith.mulf %28, %29 : vector<4x8x8xf32>
    %31 = vector.shape_cast %30 : vector<4x8x8xf32> to vector<32x8xf32>
    %32 = vector.broadcast %17 : vector<4x8x1xf32> to vector<4x8x8xf32>
    %33 = arith.subf %3, %32 : vector<4x8x8xf32>
    %34 = vector.broadcast %26 : vector<4x8x1xf32> to vector<4x8x8xf32>
    %35 = arith.mulf %33, %34 : vector<4x8x8xf32>
    %36 = vector.shape_cast %35 : vector<4x8x8xf32> to vector<32x8xf32>
    %c0_13 = arith.constant 0 : index
    %c0_14 = arith.constant 0 : index
    %c0_15 = arith.constant 0 : index
    %37 = vector.load %arg2[%c0_13, %c0_14, %c0_15] : memref<2x8x8xf32, #tpu.memory_space<vmem>>, vector<1x8x8xf32>
    %38 = vector.shape_cast %37 : vector<1x8x8xf32> to vector<8x8xf32>
    %cst_16 = arith.constant dense<0.000000e+00> : vector<32x8xf32>
    %39 = tpu.matmul %31, %38, %cst_16 {dimension_numbers = #tpu.dot_dimension_numbers<[1], [0], [0], [1], [0, 0, 1, 1], [], []>} : vector<32x8xf32>, vector<8x8xf32>, vector<32x8xf32> -> vector<32x8xf32>
    %c1_17 = arith.constant 1 : index
    %c0_18 = arith.constant 0 : index
    %c0_19 = arith.constant 0 : index
    %40 = vector.load %arg2[%c1_17, %c0_18, %c0_19] : memref<2x8x8xf32, #tpu.memory_space<vmem>>, vector<1x8x8xf32>
    %41 = vector.shape_cast %40 : vector<1x8x8xf32> to vector<8x8xf32>
    %cst_20 = arith.constant dense<0.000000e+00> : vector<32x8xf32>
    %42 = tpu.matmul %36, %41, %cst_20 {dimension_numbers = #tpu.dot_dimension_numbers<[1], [0], [0], [1], [0, 0, 1, 1], [], []>} : vector<32x8xf32>, vector<8x8xf32>, vector<32x8xf32> -> vector<32x8xf32>
    %43 = arith.addf %39, %42 : vector<32x8xf32>
    %c0_21 = arith.constant 0 : index
    %c0_22 = arith.constant 0 : index
    %44 = vector.load %arg3[%c0_21, %c0_22] : memref<1x8xf32, #tpu.memory_space<vmem>>, vector<1x8xf32>
    %45 = vector.broadcast %44 : vector<1x8xf32> to vector<32x8xf32>
    %46 = arith.addf %43, %45 : vector<32x8xf32>
    %c0_23 = arith.constant 0 : index
    %c0_24 = arith.constant 0 : index
    %47 = vector.load %arg4[%c0_23, %c0_24] : memref<32x8xf32, #tpu.memory_space<vmem>>, vector<32x8xf32>
    tpu.vector_store %arg4[%c0_23, %c0_24], %46 {strides = array<i32>} : memref<32x8xf32, #tpu.memory_space<vmem>>, vector<32x8xf32>,
    return
  }
  func.func @transform_0(%arg0: i32) -> (i32, i32, i32, i32) {
    %c0_i32 = arith.constant 0 : i32
    %c0_i32_0 = arith.constant 0 : i32
    %c0_i32_1 = arith.constant 0 : i32
    %c0_i32_2 = arith.constant 0 : i32
    return %arg0, %c0_i32, %c0_i32_0, %c0_i32_1 : i32, i32, i32, i32
  }
  func.func @transform_1(%arg0: i32) -> (i32, i32, i32) {
    %c0_i32 = arith.constant 0 : i32
    %c0_i32_0 = arith.constant 0 : i32
    %c0_i32_1 = arith.constant 0 : i32
    %c0_i32_2 = arith.constant 0 : i32
    return %c0_i32, %c0_i32_0, %c0_i32_1 : i32, i32, i32
  }
  func.func @transform_2(%arg0: i32) -> (i32, i32) {
    %c0_i32 = arith.constant 0 : i32
    %c0_i32_0 = arith.constant 0 : i32
    %c0_i32_1 = arith.constant 0 : i32
    return %c0_i32, %c0_i32_0 : i32, i32
  }
  func.func @transform_3(%arg0: i32) -> (i32, i32) {
    %c0_i32 = arith.constant 0 : i32
    %c0_i32_0 = arith.constant 0 : i32
    return %arg0, %c0_i32 : i32, i32
  }
}

</mosaic_0001>

<bundles_post_ra>
// kernel: patch_merging_forward.1
= control target key start
LH: loop header
LB: loop body
LE: loop exit
PB: predicated region body
PF: predicated region fallthrough
CT: control target
= control target key end

     0   :  { %s660_s12 = smov 0   ;;  %s766_s0 = inlined_call_operand.vmem [shape: f32[16,2,8,8], index: 0, kind: input, shape index: {}]   ;;  %s767_s1 = inlined_call_operand.vmem [shape: f32[2,8,8], index: 1, kind: input, shape index: {}]   ;;  %s768_s2 = inlined_call_operand.vmem [shape: f32[1,8], index: 2, kind: input, shape index: {}]   ;;  %s769_s3 = inlined_call_operand.vmem [shape: f32[128,8], index: 3, kind: output, shape index: {}]  }
   0x1 LB: > { %s563_s13 = sadd.s32 4294967295, %s638_s12   ;;  %p567_p0 = scmp.ge.s32.totalorder %s638_s12, 1  ;;  %s638_s12 = sphi %s660_s12, %s13_s12  }
   0x2   : > { %p139_p1 = scmp.lt.s32.totalorder %s638_s12, 5 }
   0x4   : > { %p140_p2 = pnand %p567_p0, %p139_p1 }
   0x5   : > { %s568_s14 = sshll.u32 (!%p140_p2), %s563_s13, 2 }
   0x6   : > { %143 = sbr.rel (%p140_p2) target bundleno = 408 (0x198), region = 32  ;;  %p165_p3 = scmp.lt.s32.totalorder (!%p140_p2), %s568_s14, 15 }
   0xb   : > { %s771_s14 = smov (!%p165_p3, %s568_s14), 15  ;;  %vm186_vm0 = vcmask 64512   ;;  %v577_v32 = vld [vmem:[%s767_s1 + $0x8] sm:$0xff]  ;;  %v295_v33 = vld [vmem:[%s767_s1] sm:$0xff] }
   0xc   : > { %s589_s15 = sshll.u32 %s771_s14, 4  ;;  %600 = vmatprep.subr.mxu0 %v577_v32  ;;  %608 = vmatprep.subr.mxu1 %v295_v33  ;;  %s572_s23 = sshll.u32 %s771_s14, 3 }
   0xd   : > { %s169_s18 = scalar_lea.vmem %s766_s0, %s589_s15  ;;  %601 = vmatpush3.msra.mxu0 %v577_v32  ;;  %609 = vmatpush3.msra.mxu1 %v295_v33  ;;  %s175_s28 = scalar_lea.vmem %s769_s3, %s572_s23 }
   0xe   : > { %v674_v0 = vld [vmem:[%s169_s18 + $0x10] sm:$0xff]  ;;  %v676_v1 = vld [vmem:[%s169_s18] sm:$0xff]  ;;  %v678_v2 = vld [vmem:[%s169_s18 + $0x18] sm:$0xff] }
   0xf   : > { %v190_v3 = vsel %vm186_vm0, %v674_v0, 0.0  ;;  %v187_v4 = vsel %vm186_vm0, %v676_v1, 0.0  ;;  %v684_v5 = vld [vmem:[%s169_s18 + $0x8] sm:$0xff]  ;;  %v202_v6 = vsel %vm186_vm0, %v678_v2, 0.0  ;;  %v215_v9 = vmul.f32 %v676_v1, %v676_v1  ;;  %v704_v17 = vld [vmem:[%s169_s18 + $0x20] sm:$0xff]  ;;  %v710_v20 = vld [vmem:[%s169_s18 + $0x38] sm:$0xff] }
  0x10   : > { %191 = vadd.xlane.f32.xlu1 %v190_v3  ;;  %188 = vadd.xlane.f32.xlu0 %v187_v4  ;;  %v199_v7 = vsel %vm186_vm0, %v684_v5, 0.0  ;;  %v231_v8 = vmul.f32 %v684_v5, %v684_v5  ;;  %v232_v12 = vmul.f32 %v678_v2, %v678_v2  ;;  %v216_v13 = vmul.f32 %v674_v0, %v674_v0  ;;  %v702_v16 = vld [vmem:[%s169_s18 + $0x28] sm:$0xff]  ;;  %v712_v21 = vld [vmem:[%s169_s18 + $0x30] sm:$0xff] }
  0x11   : > { %v219_v11 = vsel %vm186_vm0, %v215_v9, 0.0  ;;  %v205_v18 = vsel %vm186_vm0, %v702_v16, 0.0  ;;  %v193_v19 = vsel %vm186_vm0, %v704_v17, 0.0  ;;  %v208_v22 = vsel %vm186_vm0, %v710_v20, 0.0 }
  0x12   : > { %v235_v10 = vsel %vm186_vm0, %v231_v8, 0.0  ;;  %v238_v14 = vsel %vm186_vm0, %v232_v12, 0.0  ;;  %v222_v15 = vsel %vm186_vm0, %v216_v13, 0.0  ;;  %v196_v23 = vsel %vm186_vm0, %v712_v21, 0.0 }
  0x13   : > { %v233_v24 = vmul.f32 %v702_v16, %v702_v16  ;;  %v217_v25 = vmul.f32 %v704_v17, %v704_v17  ;;  %v234_v28 = vmul.f32 %v710_v20, %v710_v20  ;;  %v218_v29 = vmul.f32 %v712_v21, %v712_v21 }
  0x14   : > { %203 = vadd.xlane.f32.xlu1 %v202_v6  ;;  %200 = vadd.xlane.f32.xlu0 %v199_v7 }
  0x15   : > { %v241_v26 = vsel %vm186_vm0, %v233_v24, 0.0  ;;  %v225_v27 = vsel %vm186_vm0, %v217_v25, 0.0  ;;  %v244_v30 = vsel %vm186_vm0, %v234_v28, 0.0  ;;  %v228_v31 = vsel %vm186_vm0, %v218_v29, 0.0 }
  0x18   : > { %236 = vadd.xlane.f32.xlu1 %v235_v10  ;;  %220 = vadd.xlane.f32.xlu0 %v219_v11 }
  0x1c   : > { %239 = vadd.xlane.f32.xlu1 %v238_v14  ;;  %223 = vadd.xlane.f32.xlu0 %v222_v15 }
  0x20   : > { %206 = vadd.xlane.f32.xlu1 %v205_v18  ;;  %194 = vadd.xlane.f32.xlu0 %v193_v19 }
  0x24   : > { %209 = vadd.xlane.f32.xlu1 %v208_v22  ;;  %197 = vadd.xlane.f32.xlu0 %v196_v23 }
  0x28   : > { %242 = vadd.xlane.f32.xlu1 %v241_v26  ;;  %226 = vadd.xlane.f32.xlu0 %v225_v27 }
  0x2c   : > { %245 = vadd.xlane.f32.xlu1 %v244_v30  ;;  %229 = vadd.xlane.f32.xlu0 %v228_v31 }
  0x99   : > { %v192_v34 = vpop.xlane.xlu1 %191  ;;  %v189_v35 = vpop.xlane.xlu0 %188 }
  0x9d   : > { %v204_v36 = vpop.xlane.xlu1 %203  ;;  %v201_v37 = vpop.xlane.xlu0 %200 }
  0x9e   : > { %v211_v38 = vadd.f32 %v201_v37, %v189_v35  ;;  %v212_v39 = vadd.f32 %v204_v36, %v192_v34 }
  0xa0   : > { %v251_v40 = vmul.f32 0.0625, %v211_v38  ;;  %v252_v44 = vmul.f32 0.0625, %v212_v39 }
  0xa1   : > { %v237_v41 = vpop.xlane.xlu1 %236  ;;  %v221_v42 = vpop.xlane.xlu0 %220 }
  0xa2   : > { %v247_v43 = vadd.f32 %v237_v41, %v221_v42  ;;  %v259_v45 = vmul.f32 %v251_v40, %v251_v40  ;;  %v260_v52 = vmul.f32 %v252_v44, %v252_v44  ;;  %v287_v15 = vsub.f32 %v684_v5, %v251_v40 }
  0xa3   : > { %v279_v23 = vsub.f32 %v676_v1, %v251_v40  ;;  %v280_v29 = vsub.f32 %v674_v0, %v252_v44  ;;  %v288_v30 = vsub.f32 %v678_v2, %v252_v44 }
  0xa4   : > { %v255_v46 = vmul.f32 0.0625, %v247_v43 }
  0xa5   : > { %v240_v47 = vpop.xlane.xlu1 %239  ;;  %v224_v48 = vpop.xlane.xlu0 %223 }
  0xa6   : > { %v263_v49 = vsub.f32 %v255_v46, %v259_v45  ;;  %v248_v50 = vadd.f32 %v240_v47, %v224_v48 }
  0xa8   : > { %v267_v51 = vmax.f32 %v263_v49, 0.0  ;;  %v256_v53 = vmul.f32 0.0625, %v248_v50 }
  0xa9   : > { %v207_v54 = vpop.xlane.xlu1 %206  ;;  %v195_v55 = vpop.xlane.xlu0 %194 }
  0xaa   : > { %v271_v56 = vadd.f32 1e-05, %v267_v51  ;;  %v264_v57 = vsub.f32 %v256_v53, %v260_v52  ;;  %v213_v59 = vadd.f32 %v207_v54, %v195_v55 }
  0xac   : > { %624 = vrsqrt.f32 %v271_v56  ;;  %v268_v58 = vmax.f32 %v264_v57, 0.0  ;;  %v253_v63 = vmul.f32 0.0625, %v213_v59 }
  0xad   : > { %v210_v60 = vpop.xlane.xlu1 %209  ;;  %v198_v61 = vpop.xlane.xlu0 %197 }
  0xae   : > { %v272_v62 = vadd.f32 1e-05, %v268_v58  ;;  %v214_v3 = vadd.f32 %v210_v60, %v198_v61  ;;  %v261_v9 = vmul.f32 %v253_v63, %v253_v63  ;;  %v281_v0 = vsub.f32 %v704_v17, %v253_v63 }
  0xaf   : > { %v289_v1 = vsub.f32 %v702_v16, %v253_v63 }
  0xb0   : > { %626 = vrsqrt.f32 %v272_v62  ;;  %v254_v8 = vmul.f32 0.0625, %v214_v3 }
  0xb1   : > { %v243_v4 = vpop.xlane.xlu1 %242  ;;  %v227_v6 = vpop.xlane.xlu0 %226 }
  0xb2   : > { %v249_v7 = vadd.f32 %v243_v4, %v227_v6  ;;  %v262_v19 = vmul.f32 %v254_v8, %v254_v8  ;;  %v282_v37 = vsub.f32 %v712_v21, %v254_v8  ;;  %v290_v38 = vsub.f32 %v710_v20, %v254_v8  ;;  %v586_v21 = vld [vmem:[%s768_s2] ss:$0 sm:$0xff] }
  0xb4   : > { %v257_v10 = vmul.f32 0.0625, %v249_v7 }
  0xb5   : > { %v246_v11 = vpop.xlane.xlu1 %245  ;;  %v230_v12 = vpop.xlane.xlu0 %229 }
  0xb6   : > { %v265_v13 = vsub.f32 %v257_v10, %v261_v9  ;;  %v250_v14 = vadd.f32 %v246_v11, %v230_v12 }
  0xb8   : > { %v269_v18 = vmax.f32 %v265_v13, 0.0  ;;  %v258_v22 = vmul.f32 0.0625, %v250_v14 }
  0xb9   : > { %v625_v24 = vpop.eup %624 }
  0xba   : > { %v273_v25 = vadd.f32 1e-05, %v269_v18  ;;  %v266_v26 = vsub.f32 %v258_v22, %v262_v19  ;;  %v291_v27 = vmul.f32 %v625_v24, %v287_v15  ;;  %v283_v28 = vmul.f32 %v625_v24, %v279_v23 }
  0xbc   : > { %628 = vrsqrt.f32 %v273_v25  ;;  %v270_v31 = vmax.f32 %v266_v26, 0.0  ;;  %602 = vmatprep.mubr.msk.f32.mxu0 %vm186_vm0, %v291_v27  ;;  %610 = vmatprep.mubr.msk.f32.mxu1 %vm186_vm0, %v283_v28 }
  0xbd   : > { %v627_v5 = vpop.eup %626 }
  0xbe   : > { %v274_v32 = vadd.f32 1e-05, %v270_v31  ;;  %v292_v33 = vmul.f32 %v627_v5, %v288_v30  ;;  %v284_v34 = vmul.f32 %v627_v5, %v280_v29 }
  0xc0   : > { %630 = vrsqrt.f32 %v274_v32  ;;  %603 = vmatmul.mubr.msk.f32.vlgmr.msra.gmra.mxu0 %vm186_vm0, %v292_v33  ;;  %611 = vmatmul.mubr.msk.f32.vlgmr.msra.gmra.mxu1 %vm186_vm0, %v284_v34 }
  0xc9   : > { %v629_v2 = vpop.eup %628 }
  0xca   : > { %v293_v35 = vmul.f32 %v629_v2, %v289_v1  ;;  %v285_v36 = vmul.f32 %v629_v2, %v281_v0 }
  0xcc   : > { %605 = vmatprep.mubr.msk.f32.mxu0 %vm186_vm0, %v293_v35  ;;  %613 = vmatprep.mubr.msk.f32.mxu1 %vm186_vm0, %v285_v36 }
  0xcd   : > { %v631_v39 = vpop.eup %630 }
  0xce   : > { %v294_v40 = vmul.f32 %v631_v39, %v290_v38  ;;  %v286_v41 = vmul.f32 %v631_v39, %v282_v37 }
  0xd0   : > { %606 = vmatmul.mubr.msk.f32.gmra.mxu0 %vm186_vm0, %v294_v40  ;;  %614 = vmatmul.mubr.msk.f32.gmra.mxu1 %vm186_vm0, %v286_v41 }
 0x180   : > { %v604_v16 = vpop.f32.mrf.mxu0  ;;  %v612_v17 = vpop.f32.mrf.mxu1 }
 0x181   : > { %v479_v42 = vadd.f32 %v612_v17, %v604_v16 }
 0x182   : > { %v376_v20 = vpop.f32.mrf.mxu0  ;;  %v473_v43 = vpop.f32.mrf.mxu1 }
 0x183   : > { %v500_v44 = vadd.f32 %v586_v21, %v479_v42  ;;  %v474_v45 = vadd.f32 %v473_v43, %v376_v20 }
 0x185   : > { %504 = vst.msk [vmem:[%s175_s28 + $0x8] sm:$0xff] %vm186_vm0, %v500_v44  ;;  %v499_v46 = vadd.f32 %v586_v21, %v474_v45 }
 0x187   : > { %503 = vst.msk [vmem:[%s175_s28] sm:$0xff] %vm186_vm0, %v499_v46 }
 0x190   : > { %v607_v47 = vpop.f32.mrf.mxu0  ;;  %v615_v48 = vpop.f32.mrf.mxu1 }
 0x191   : > { %v489_v49 = vadd.f32 %v615_v48, %v607_v47 }
 0x192   : > { %v386_v50 = vpop.f32.mrf.mxu0  ;;  %v483_v51 = vpop.f32.mrf.mxu1 }
 0x193   : > { %v502_v52 = vadd.f32 %v586_v21, %v489_v49  ;;  %v484_v53 = vadd.f32 %v483_v51, %v386_v50 }
 0x195   : > { %506 = vst.msk [vmem:[%s175_s28 + $0x18] sm:$0xff] %vm186_vm0, %v502_v52  ;;  %v501_v54 = vadd.f32 %v586_v21, %v484_v53 }
 0x197   : > { %505 = vst.msk [vmem:[%s175_s28 + $0x10] sm:$0xff] %vm186_vm0, %v501_v54 }
 0x198 PF: > { %s13_s12 = sadd.s32 1, %s638_s12  }
 0x199   : > { %p10_p4 = scmp.ge.s32.totalorder %s13_s12, 6  }
 0x19b   :  { %12 = sbr.rel (!%p10_p4) target bundleno = 1 (0x1), region = 64 }

</bundles_post_ra>
